<compile_context>
chip_gen: v7x
topology: tpu7x:2x2x1
jax: 0.10.0
libtpu: 0.0.40
codegen_flags: <defaults>
</compile_context>

<pallas_src>
import functools

import jax
import jax.numpy as jnp
from jax.experimental import pallas as pl
from jax.experimental.pallas import tpu as pltpu


def _round_up(x, m):
    return ((x + m - 1) // m) * m


def kktnet_kernel(x_ref, w1_ref, b1_ref, wh_ref, bh_ref, out_ref,
                  *, n_sol, n_ineq):
    """Fused forward for one batch tile.

    x_ref  : (TB, IN)        compute dtype (bf16 or f32)
    w1_ref : (IN, H)         compute dtype
    b1_ref : (1, H)          f32
    wh_ref : (H, N_PAD)      compute dtype, columns = [sol | ineq | eq | 0-pad]
    bh_ref : (1, N_PAD)      f32
    out_ref: (TB, N_PAD)     f32, lane-dense fused output
    """
    # shared_net: Linear + ReLU  (f32 accumulation on the MXU)
    emb = jnp.dot(x_ref[...], w1_ref[...],
                  preferred_element_type=jnp.float32) + b1_ref[...]
    emb = jnp.maximum(emb, 0.0)

    # fused heads: single matmul against concatenated weights
    heads = jnp.dot(emb.astype(wh_ref.dtype), wh_ref[...],
                    preferred_element_type=jnp.float32) + bh_ref[...]

    # ReLU only on the inequality-multiplier column range.
    col = jax.lax.broadcasted_iota(jnp.int32, heads.shape, 1)
    is_ineq = (col >= n_sol) & (col < n_sol + n_ineq)
    heads = jnp.where(is_ineq, jnp.maximum(heads, 0.0), heads)

    # single lane-dense (unmasked) store
    out_ref[...] = heads.astype(out_ref.dtype)


def kktnet_forward(x, params, *, tile_b=256, compute_dtype=jnp.bfloat16):
    """Wrapper matching KKTNet.forward: returns [solution, ineq_mult, eq_mult]."""
    (w1, b1), (ws, bs), (wi, bi), (we, be) = params
    batch, in_features = x.shape
    hidden = w1.shape[1]
    n_sol, n_ineq, n_eq = ws.shape[1], wi.shape[1], we.shape[1]
    n_heads = n_sol + n_ineq + n_eq
    n_pad = _round_up(max(n_heads, 128), 128)          # lane-dense fused output

    # --- concatenate + pad head weights/biases (sol | ineq | eq | zero-pad) ---
    wh = jnp.concatenate([ws, wi, we], axis=1)
    wh = jnp.pad(wh, ((0, 0), (0, n_pad - n_heads))).astype(compute_dtype)
    bh = jnp.concatenate([bs, bi, be], axis=1).astype(jnp.float32)
    bh = jnp.pad(bh, ((0, 0), (0, n_pad - n_heads)))

    # --- batch tiling (sublane-aligned) ---
    sub = 16 if compute_dtype == jnp.bfloat16 else 8
    tb = min(tile_b, _round_up(batch, sub))
    padded_batch = _round_up(batch, tb)
    x_p = x
    if padded_batch != batch:
        x_p = jnp.pad(x, ((0, padded_batch - batch), (0, 0)))
    x_p = x_p.astype(compute_dtype)
    w1_c = w1.astype(compute_dtype)
    b1_c = b1.astype(jnp.float32)

    grid = (padded_batch // tb,)

    kernel = functools.partial(kktnet_kernel, n_sol=n_sol, n_ineq=n_ineq)

    flops = 2 * padded_batch * (in_features * hidden + hidden * n_pad)
    bytes_accessed = (x_p.size * x_p.dtype.itemsize
                      + w1_c.size * w1_c.dtype.itemsize
                      + wh.size * wh.dtype.itemsize
                      + (b1_c.size + bh.size) * 4
                      + padded_batch * n_pad * 4)

    fused = pl.pallas_call(
        kernel,
        out_shape=jax.ShapeDtypeStruct((padded_batch, n_pad), jnp.float32),
        grid=grid,
        in_specs=[
            pl.BlockSpec((tb, in_features), lambda i: (i, 0)),   # x: batch-tiled
            pl.BlockSpec((in_features, hidden), lambda i: (0, 0)),  # w1 resident
            pl.BlockSpec((1, hidden), lambda i: (0, 0)),             # b1 resident
            pl.BlockSpec((hidden, n_pad), lambda i: (0, 0)),         # fused W
            pl.BlockSpec((1, n_pad), lambda i: (0, 0)),              # fused b
        ],
        out_specs=pl.BlockSpec((tb, n_pad), lambda i: (i, 0)),
        compiler_params=pltpu.CompilerParams(
            dimension_semantics=("parallel",)),
        cost_estimate=pl.CostEstimate(flops=flops, transcendentals=0,
                                      bytes_accessed=bytes_accessed),
    )(x_p, w1_c, b1_c, wh, bh)

    sol = fused[:batch, :n_sol]
    ineq = fused[:batch, n_sol:n_sol + n_ineq]
    eq = fused[:batch, n_sol + n_ineq:n_heads]
    return [sol, ineq, eq]


def init_params(key, in_features, hidden, n_sol, n_ineq, n_eq):
    """PyTorch-style uniform +/- 1/sqrt(fan_in) init."""
    def linear(key, fan_in, fan_out):
        kw, kb = jax.random.split(key)
        bound = 1.0 / jnp.sqrt(jnp.float32(fan_in))
        w = jax.random.uniform(kw, (fan_in, fan_out), jnp.float32, -bound, bound)
        b = jax.random.uniform(kb, (1, fan_out), jnp.float32, -bound, bound)
        return w, b

    k1, k2, k3, k4 = jax.random.split(key, 4)
    return (
        linear(k1, in_features, hidden),   # shared
        linear(k2, hidden, n_sol),         # solution head
        linear(k3, hidden, n_ineq),        # inequality multiplier head
        linear(k4, hidden, n_eq),          # equality multiplier head
    )


def _reference_forward(x, params, compute_dtype=jnp.bfloat16):
    """Pure-JAX reference mirroring the kernel's bf16-operand / f32-accum math."""
    (w1, b1), (ws, bs), (wi, bi), (we, be) = params
    cd = lambda a: a.astype(compute_dtype).astype(jnp.float32)
    hi = jax.lax.Precision.HIGHEST
    emb = jnp.maximum(jnp.dot(cd(x), cd(w1), precision=hi) + b1, 0.0)
    emb = cd(emb)  # kernel casts the embedding to compute dtype for head matmul
    sol = jnp.dot(emb, cd(ws), precision=hi) + bs
    ineq = jnp.maximum(jnp.dot(emb, cd(wi), precision=hi) + bi, 0.0)
    eq = jnp.dot(emb, cd(we), precision=hi) + be
    return [sol, ineq, eq]


if __name__ == "__main__":
    key = jax.random.PRNGKey(0)
    k_x, k_p = jax.random.split(key)

    batch, in_features, hidden = 8, 32, 64
    n_sol, n_ineq, n_eq = 16, 8, 4

    x = jax.random.normal(k_x, (batch, in_features), jnp.float32)
    params = init_params(k_p, in_features, hidden, n_sol, n_ineq, n_eq)

    # TODO(synk): KKTNet allows inequality/equality heads to be None; this
    # kernel instantiates all three (the common case).
    outputs = kktnet_forward(x, params)
    outputs = [jax.block_until_ready(o) for o in outputs]

    refs = _reference_forward(x, params)
    for got, ref in zip(outputs, refs):
        assert got.shape == ref.shape
        assert jnp.allclose(got, ref, atol=1e-3, rtol=1e-3), (
            float(jnp.max(jnp.abs(got - ref))))

    print("KERNEL_OK")
</pallas_src>

<mosaic_0001>
module attributes {stable_mosaic.version = 11 : i64} {
  func.func @kktnet_kernel(%arg0: i32, %arg1: memref<16x32xbf16, #tpu.memory_space<vmem>>, %arg2: memref<32x64xbf16, #tpu.memory_space<vmem>>, %arg3: memref<1x64xf32, #tpu.memory_space<vmem>>, %arg4: memref<64x128xbf16, #tpu.memory_space<vmem>>, %arg5: memref<1x128xf32, #tpu.memory_space<vmem>>, %arg6: memref<16x128xf32, #tpu.memory_space<vmem>>) attributes {dimension_semantics = [#tpu.dimension_semantics<parallel>], iteration_bounds = array<i64: 1>, scalar_prefetch = 0 : i64, scratch_operands = 0 : i64, tpu.core_type = #tpu.core_type<tc>, window_params = [{transform_indices = @transform_0, window_bounds = array<i64: 16, 32>}, {pipeline_mode = #tpu.pipeline_mode<synchronous>, transform_indices = @transform_1, window_bounds = array<i64: 32, 64>}, {pipeline_mode = #tpu.pipeline_mode<synchronous>, transform_indices = @transform_2, window_bounds = array<i64: 1, 64>}, {pipeline_mode = #tpu.pipeline_mode<synchronous>, transform_indices = @transform_3, window_bounds = array<i64: 64, 128>}, {pipeline_mode = #tpu.pipeline_mode<synchronous>, transform_indices = @transform_4, window_bounds = array<i64: 1, 128>}, {transform_indices = @transform_5, window_bounds = array<i64: 16, 128>}]} {
    %c0 = arith.constant 0 : index
    %c0_0 = arith.constant 0 : index
    %0 = vector.load %arg1[%c0, %c0_0] : memref<16x32xbf16, #tpu.memory_space<vmem>>, vector<16x32xbf16>
    %c0_1 = arith.constant 0 : index
    %c0_2 = arith.constant 0 : index
    %1 = vector.load %arg2[%c0_1, %c0_2] : memref<32x64xbf16, #tpu.memory_space<vmem>>, vector<32x64xbf16>
    %cst = arith.constant dense<0.000000e+00> : vector<16x64xf32>
    %2 = tpu.matmul %0, %1, %cst {dimension_numbers = #tpu.dot_dimension_numbers<[1], [0], [0], [1], [0, 0, 1, 1], [], []>} : vector<16x32xbf16>, vector<32x64xbf16>, vector<16x64xf32> -> vector<16x64xf32>
    %c0_3 = arith.constant 0 : index
    %c0_4 = arith.constant 0 : index
    %3 = vector.load %arg3[%c0_3, %c0_4] : memref<1x64xf32, #tpu.memory_space<vmem>>, vector<1x64xf32>
    %4 = vector.broadcast %3 : vector<1x64xf32> to vector<16x64xf32>
    %5 = arith.addf %2, %4 : vector<16x64xf32>
    %cst_5 = arith.constant 0.000000e+00 : f32
    %6 = vector.broadcast %cst_5 : f32 to vector<16x64xf32>
    %7 = arith.maximumf %5, %6 : vector<16x64xf32>
    %8 = arith.truncf %7 : vector<16x64xf32> to vector<16x64xbf16>
    %c0_6 = arith.constant 0 : index
    %c0_7 = arith.constant 0 : index
    %9 = vector.load %arg4[%c0_6, %c0_7] : memref<64x128xbf16, #tpu.memory_space<vmem>>, vector<64x128xbf16>
    %cst_8 = arith.constant dense<0.000000e+00> : vector<16x128xf32>
    %10 = tpu.matmul %8, %9, %cst_8 {dimension_numbers = #tpu.dot_dimension_numbers<[1], [0], [0], [1], [0, 0, 1, 1], [], []>} : vector<16x64xbf16>, vector<64x128xbf16>, vector<16x128xf32> -> vector<16x128xf32>
    %c0_9 = arith.constant 0 : index
    %c0_10 = arith.constant 0 : index
    %11 = vector.load %arg5[%c0_9, %c0_10] : memref<1x128xf32, #tpu.memory_space<vmem>>, vector<1x128xf32>
    %12 = vector.broadcast %11 : vector<1x128xf32> to vector<16x128xf32>
    %13 = arith.addf %10, %12 : vector<16x128xf32>
    %14 = tpu.iota {dimensions = array<i32: 1>} : vector<16x128xi32>
    %c16_i32 = arith.constant 16 : i32
    %15 = vector.broadcast %c16_i32 : i32 to vector<16x128xi32>
    %16 = arith.cmpi sge, %14, %15 : vector<16x128xi32>
    %c24_i32 = arith.constant 24 : i32
    %17 = vector.broadcast %c24_i32 : i32 to vector<16x128xi32>
    %18 = arith.cmpi slt, %14, %17 : vector<16x128xi32>
    %19 = arith.andi %16, %18 : vector<16x128xi1>
    %cst_11 = arith.constant 0.000000e+00 : f32
    %20 = vector.broadcast %cst_11 : f32 to vector<16x128xf32>
    %21 = arith.maximumf %13, %20 : vector<16x128xf32>
    %22 = arith.select %19, %21, %13 : vector<16x128xi1>, vector<16x128xf32>
    %c0_12 = arith.constant 0 : index
    %c0_13 = arith.constant 0 : index
    %23 = vector.load %arg6[%c0_12, %c0_13] : memref<16x128xf32, #tpu.memory_space<vmem>>, vector<16x128xf32>
    tpu.vector_store %arg6[%c0_12, %c0_13], %22 {strides = array<i32>} : memref<16x128xf32, #tpu.memory_space<vmem>>, vector<16x128xf32>,
    return
  }
  func.func @transform_0(%arg0: i32) -> (i32, i32) {
    %c0_i32 = arith.constant 0 : i32
    %c0_i32_0 = arith.constant 0 : i32
    return %arg0, %c0_i32 : i32, i32
  }
  func.func @transform_1(%arg0: i32) -> (i32, i32) {
    %c0_i32 = arith.constant 0 : i32
    %c0_i32_0 = arith.constant 0 : i32
    %c0_i32_1 = arith.constant 0 : i32
    return %c0_i32, %c0_i32_0 : i32, i32
  }
  func.func @transform_2(%arg0: i32) -> (i32, i32) {
    %c0_i32 = arith.constant 0 : i32
    %c0_i32_0 = arith.constant 0 : i32
    %c0_i32_1 = arith.constant 0 : i32
    return %c0_i32, %c0_i32_0 : i32, i32
  }
  func.func @transform_3(%arg0: i32) -> (i32, i32) {
    %c0_i32 = arith.constant 0 : i32
    %c0_i32_0 = arith.constant 0 : i32
    %c0_i32_1 = arith.constant 0 : i32
    return %c0_i32, %c0_i32_0 : i32, i32
  }
  func.func @transform_4(%arg0: i32) -> (i32, i32) {
    %c0_i32 = arith.constant 0 : i32
    %c0_i32_0 = arith.constant 0 : i32
    %c0_i32_1 = arith.constant 0 : i32
    return %c0_i32, %c0_i32_0 : i32, i32
  }
  func.func @transform_5(%arg0: i32) -> (i32, i32) {
    %c0_i32 = arith.constant 0 : i32
    %c0_i32_0 = arith.constant 0 : i32
    return %arg0, %c0_i32 : i32, i32
  }
}

</mosaic_0001>

<bundles_post_ra>
// kernel: tpu_custom_call.1
= control target key start
LH: loop header
LB: loop body
LE: loop exit
PB: predicated region body
PF: predicated region fallthrough
CT: control target
= control target key end

     0   :  { %10 = vsyncpa [#allocation3], 0  ;;  %s514_s0 = inlined_call_operand.hbm [shape: bf16[16,32], index: 0, kind: input, shape index: {}]   ;;  %s515_s1 = inlined_call_operand.hbm [shape: bf16[32,64], index: 1, kind: input, shape index: {}]   ;;  %s516_s2 = inlined_call_operand.vmem [shape: f32[1,64], index: 2, kind: input, shape index: {}]   ;;  %s517_s3 = inlined_call_operand.hbm [shape: bf16[64,128], index: 3, kind: input, shape index: {}]   ;;  %s518_s4 = inlined_call_operand.vmem [shape: f32[1,128], index: 4, kind: input, shape index: {}]   ;;  %s519_s5 = inlined_call_operand.hbm [shape: f32[16,128], index: 5, kind: output, shape index: {}]  }
   0x1   :  { %11 = vsyncpa [#allocation6], 0 }
   0x2   :  { %12 = vsyncpa [#allocation4], 0  ;;  %s404_s18 = smov [#allocation5]   ;;  %s405_s20 = smov [#allocation2]  }
   0x3   :  { %s30_s19 = sshll.u32 %s404_s18, 4  ;;  %s18_s21 = sshll.u32 %s405_s20, 4  ;;  %s31_s19 = int_to_ptr.vmem [resolvable:$true] %s30_s19  ;;  %s444_s21 = int_to_ptr.vmem [resolvable:$true] %s18_s21 }
   0x4   :  { %s310_s24 = scalar_lea.hbm %s515_s1, 256 }
   0x5   :  { %p311_p0 = scmp.ne.s32.totalorder %s515_s1, %s310_s24  ;;  %p314_p1 = scmp.lt.u32.totalorder %s310_s24, %s515_s1 }
   0x7   :  { %p316_p2 = pnand %p314_p1, %p311_p0 }
   0x9   :  { %319 = shalt.err (!%p316_p2)
}
   0xa   :  { %s320_s29 = scalar_lea.vmem %s31_s19, 256  ;;  %p325_p4 = scmp.lt.s32.totalorder %s31_s19, %s31_s19 }
   0xb   :  { %p321_p3 = scmp.ne.s32.totalorder %s31_s19, %s320_s29  ;;  %p326_p5 = scmp.lt.s32.totalorder %s320_s29, %s320_s29 }
   0xd   :  { %p327_p6 = por %p326_p5, %p325_p4 }
   0xf   :  { %p328_p7 = pnand %p327_p6, %p321_p3 }
  0x11   :  { %331 = shalt.err (!%p328_p7)
}
  0x12   :  { %s406_s30 = smov 64   ;;  %s407_s6 = smov 4  }
  0x13   :  { %36 = dma.hbm_to_vmem [thread:$0]  %s515_s1, 256, %s31_s19, [#allocation6], %s406_s30, %s406_s30, %s407_s6  }
  0x14   :  { %s332_s11 = scalar_lea.hbm %s514_s0, 128 }
  0x15   :  { %p333_p8 = scmp.ne.s32.totalorder %s514_s0, %s332_s11  ;;  %p336_p9 = scmp.lt.u32.totalorder %s332_s11, %s514_s0 }
  0x17   :  { %p338_p10 = pnand %p336_p9, %p333_p8 }
  0x19   :  { %341 = shalt.err (!%p338_p10)
}
  0x1a   :  { %s342_s16 = scalar_lea.vmem %s444_s21, 128  ;;  %p347_p12 = scmp.lt.s32.totalorder %s444_s21, %s444_s21 }
  0x1b   :  { %p343_p11 = scmp.ne.s32.totalorder %s444_s21, %s342_s16  ;;  %p348_p13 = scmp.lt.s32.totalorder %s342_s16, %s342_s16 }
  0x1d   :  { %p349_p0 = por %p348_p13, %p347_p12 }
  0x1f   :  { %p350_p1 = pnand %p349_p0, %p343_p11 }
  0x21   :  { %353 = shalt.err (!%p350_p1)
}
  0x22   :  { %24 = dma.hbm_to_vmem [thread:$0]  %s514_s0, 128, %s444_s21, [#allocation3], %s406_s30, %s406_s30, %s407_s6  }
  0x23   :  { %s408_s18 = smov [#allocation7]   ;;  %s354_s23 = scalar_lea.hbm %s517_s3, 512 }
  0x24   :  { %s44_s19 = sshll.u32 %s408_s18, 4  ;;  %p355_p2 = scmp.ne.s32.totalorder %s517_s3, %s354_s23  ;;  %s45_s19 = int_to_ptr.vmem [resolvable:$true] %s44_s19 }
  0x25   :  { %p358_p3 = scmp.lt.u32.totalorder %s354_s23, %s517_s3 }
  0x27   :  { %p360_p4 = pnand %p358_p3, %p355_p2 }
  0x29   :  { %363 = shalt.err (!%p360_p4)
}
  0x2a   :  { %s364_s28 = scalar_lea.vmem %s45_s19, 512  ;;  %p369_p6 = scmp.lt.s32.totalorder %s45_s19, %s45_s19 }
  0x2b   :  { %p365_p5 = scmp.ne.s32.totalorder %s45_s19, %s364_s28  ;;  %p370_p7 = scmp.lt.s32.totalorder %s364_s28, %s364_s28 }
  0x2d   :  { %p371_p8 = por %p370_p7, %p369_p6 }
  0x2f   :  { %p372_p9 = pnand %p371_p8, %p365_p5 }
  0x31   :  { %375 = shalt.err (!%p372_p9)
}
  0x32   :  { %50 = dma.hbm_to_vmem [thread:$0]  %s517_s3, 512, %s45_s19, [#allocation6], %s406_s30, %s406_s30, %s407_s6  }
  0x33   :  { %398 = dma.done.wait [#allocation3], 128  }
  0x34   :  { %399 = vsyncadd [#allocation3], 4294967168 }
  0x35   :  { %400 = dma.done.wait [#allocation6], 768  }
  0x36   :  { %401 = vsyncadd [#allocation6], 4294966528  ;;  %v409_v0 = vmov 0.0   ;;  %vm410_vm0 = vmmov 0   ;;  %v303_v1 = vld [vmem:[#allocation5] sm:$0xff]   ;;  %v304_v2 = vld [vmem:[#allocation5 + $0x8] sm:$0xff]   ;;  %v225_v18 = vlaneseq }
  0x37   :  { %273 = vmatprep.subr.bf16.mxu0 %v409_v0  ;;  %277 = vmatprep.mubr.msk.bf16.mxu0 %vm410_vm0, %v409_v0  ;;  %v306_v3 = vld [vmem:[#allocation7] sm:$0xff]   ;;  %v305_v4 = vld [vmem:[#allocation2] sm:$0xff]   ;;  %vm93_vm1 = vcmask 261120   ;;  %v308_v6 = vld [vmem:[#allocation7 + $0x10] sm:$0xff]   ;;  %vm180_vm2 = vcmask 523264  }
  0x38   :  { %281 = vmatprep.subr.bf16.mxu1 %v409_v0  ;;  %289 = vmatprep.mubr.msk.bf16.mxu1 %vm410_vm0, %v409_v0  ;;  %v307_v5 = vld [vmem:[#allocation7 + $0x8] sm:$0xff]   ;;  %v309_v7 = vld [vmem:[#allocation7 + $0x18] sm:$0xff]   ;;  %v226_v19 = vand.u32 127, %v225_v18 }
  0x39   :  { %274 = vmatpush3.bf16.msra.mxu0 %v303_v1  ;;  %282 = vmatpush3.bf16.msra.mxu1 %v306_v3  ;;  %v254_v8 = vld [vmem:[%s516_s2] ss:$0 sm:$0xff]  ;;  %s411_s2 = smov [#allocation8]  }
  0x3a   :  { %275 = vmatprep.subr.bf16.mxu0 %v409_v0  ;;  %283 = vmatprep.subr.bf16.mxu1 %v409_v0  ;;  %v259_v20 = vld [vmem:[%s518_s4] ss:$0 sm:$0xff]  ;;  %vm227_vm3 = vcmp.ge.s32.totalorder %v226_v19, 16  ;;  %vm228_vm4 = vcmp.lt.s32.totalorder %v226_v19, 24  ;;  %s241_s7 = sshll.u32 %s411_s2, 4  ;;  %s242_s7 = int_to_ptr.vmem [resolvable:$true] %s241_s7 }
  0x3b   :  { %vm229_vm5 = vmand %vm227_vm3, %vm228_vm4  ;;  %s376_s8 = scalar_lea.vmem %s242_s7, 256  ;;  %p381_p11 = scmp.lt.s32.totalorder %s242_s7, %s242_s7 }
  0x3c   :  { %p377_p10 = scmp.ne.s32.totalorder %s242_s7, %s376_s8  ;;  %p382_p12 = scmp.lt.s32.totalorder %s376_s8, %s376_s8 }
  0x3d   :  { %276 = vmatpush3.bf16.msra.mxu0 %v304_v2  ;;  %284 = vmatpush3.bf16.msra.mxu1 %v307_v5 }
  0x3e   :  { %285 = vmatprep.subr.bf16.mxu1 %v409_v0  ;;  %p383_p13 = por %p382_p12, %p381_p11 }
  0x40   :  { %278 = vmatmul.mubr.msk.bf16.vlgmr.msra.gmra.mrb[0].mxu0 %vm93_vm1, %v305_v4  ;;  %p384_p0 = pnand %p383_p13, %p377_p10 }
  0x41   :  { %286 = vmatpush3.bf16.msra.mxu1 %v308_v6 }
  0x42   :  { %287 = vmatprep.subr.bf16.mxu1 %v409_v0 }
  0x45   :  { %288 = vmatpush3.bf16.msra.mxu1 %v309_v7 }
 0x113   :  { %v131_v9 = vpop.f32.mrb[0].mxu0 }
 0x114   :  { %v132_v10 = vadd.f32 %v254_v8, %v131_v9  ;;  %v279_v11 = vpop.f32.mrb[1].mxu0 }
 0x115   :  { %v134_v12 = vpop.f32.mrb[2].mxu0 }
 0x116   :  { %v135_v13 = vadd.f32 %v254_v8, %v134_v12  ;;  %v280_v14 = vpop.f32.mrb[3].mxu0  ;;  %v138_v15 = vmax.f32 %v132_v10, 0.0 }
 0x118   :  { %v139_v16 = vmax.f32 %v135_v13, 0.0 }
 0x11a   :  { %v140_v17 = vpack.c.bf16 %v139_v16, %v138_v15 }
 0x11c   :  { %290 = vmatmul.mubr.msk.bf16.vlgmr.msra.gmra.mrb[0].mxu1 %vm180_vm2, %v140_v17 }
 0x1ef   :  { %v218_v21 = vpop.f32.mrb[0].mxu1 }
 0x1f0   :  { %v219_v22 = vadd.f32 %v259_v20, %v218_v21  ;;  %v291_v23 = vpop.f32.mrb[1].mxu1 }
 0x1f1   :  { %v221_v24 = vpop.f32.mrb[2].mxu1 }
 0x1f2   :  { %v230_v25 = vmax.f32 %v219_v22, 0.0  ;;  %v222_v26 = vadd.f32 %v259_v20, %v221_v24  ;;  %v292_v27 = vpop.f32.mrb[3].mxu1 }
 0x1f4   :  { %v232_v28 = vsel %vm229_vm5, %v230_v25, %v219_v22  ;;  %v231_v29 = vmax.f32 %v222_v26, 0.0 }
 0x1f5   :  { %234 = vst [vmem:[#allocation8] sm:$0xff] %v232_v28 }
 0x1f6   :  { %v233_v30 = vsel %vm229_vm5, %v231_v29, %v222_v26 }
 0x1f7   :  { %235 = vst [vmem:[#allocation8 + $0x8] sm:$0xff] %v233_v30 }
 0x1f8   :  { %387 = shalt.err (!%p384_p0)
}
 0x1f9   :  { %s388_s10 = scalar_lea.hbm %s519_s5, 256 }
 0x1fa   :  { %p389_p1 = scmp.ne.s32.totalorder %s519_s5, %s388_s10  ;;  %p392_p2 = scmp.lt.u32.totalorder %s388_s10, %s519_s5 }
 0x1fc   :  { %p394_p3 = pnand %p392_p2, %p389_p1 }
 0x1fe   :  { %397 = shalt.err (!%p394_p3)
}
 0x1ff   :  { %s412_s15 = smov 128   ;;  %s413_s16 = smov 8  }
 0x200   :  { %247 = dma.vmem_to_hbm [thread:$0]  %s242_s7, 256, %s519_s5, [#allocation4], %s412_s15, %s412_s15, %s413_s16  }
 0x201   :  { %402 = dma.done.wait [#allocation4], 256  }
 0x202   :  { %403 = vsyncadd [#allocation4], 4294967040 }
 0x203   :  { %251 = vsyncpa [#allocation3], 1 }
 0x204   :  { %252 = vsyncpa [#allocation6], 1 }
 0x205   :  { %253 = vsyncpa [#allocation4], 1 }

</bundles_post_ra>
